<compile_context>
chip_gen: v7x
topology: tpu7x:2x2x1
jax: 0.10.0
libtpu: 0.0.40
codegen_flags: <defaults>
</compile_context>

<pallas_src>
import math

import jax
import jax.numpy as jnp
from jax.experimental import pallas as pl
from jax.experimental.pallas import tpu as pltpu

_LANE = 128
_SUBLANE = 8


def _round_up(x, m):
    return ((x + m - 1) // m) * m


def _actor_fused_kernel(x_ref, w1_ref, b1_ref, w2_ref, b2_ref,
                        wh1_ref, bh1_ref, wh2_ref, bh2_ref, o_ref):
    """Entire ActorDiscretePPO.forward for one batch tile, fully fused.

    Matmul operands are bf16 (native MXU rate); accumulation, bias-add and
    ReLU run in f32.
    """
    x = x_ref[...]                                                   # bf16
    # main_net: Linear -> ReLU -> Linear -> ReLU
    h = jnp.dot(x, w1_ref[...], preferred_element_type=jnp.float32) + b1_ref[...]
    h = jnp.maximum(h, 0.0).astype(jnp.bfloat16)
    h = jnp.dot(h, w2_ref[...], preferred_element_type=jnp.float32) + b2_ref[...]
    h = jnp.maximum(h, 0.0).astype(jnp.bfloat16)
    # All heads at once: stacked first layers -> ReLU -> block-diagonal second
    # layers.  Output columns are already the concatenation over heads.
    hh = jnp.dot(h, wh1_ref[...], preferred_element_type=jnp.float32) + bh1_ref[...]
    hh = jnp.maximum(hh, 0.0).astype(jnp.bfloat16)
    o = jnp.dot(hh, wh2_ref[...], preferred_element_type=jnp.float32) + bh2_ref[...]
    o_ref[...] = o.astype(o_ref.dtype)


def _build_call(tb, b_pad, state_dim, weights, biases, out_pad,
                vmem_limit, cost, single_buffer_weights):
    w1, w2, wh1, wh2 = weights
    b1, b2, bh1, bh2 = biases

    def w_spec(shape):
        if single_buffer_weights:
            # Constant-index (weight-stationary) blocks: one VMEM buffer is
            # enough -> halves the resident weight footprint.
            return pl.BlockSpec(shape, lambda i: (0, 0),
                                pipeline_mode=pl.Buffered(1))
        return pl.BlockSpec(shape, lambda i: (0, 0))

    return pl.pallas_call(
        _actor_fused_kernel,
        out_shape=jax.ShapeDtypeStruct((b_pad, out_pad), jnp.float32),
        grid=(b_pad // tb,),
        in_specs=[
            pl.BlockSpec((tb, state_dim), lambda i: (i, 0)),   # activations stream
            w_spec(w1.shape), w_spec(b1.shape),
            w_spec(w2.shape), w_spec(b2.shape),
            w_spec(wh1.shape), w_spec(bh1.shape),
            w_spec(wh2.shape), w_spec(bh2.shape),
        ],
        out_specs=pl.BlockSpec((tb, out_pad), lambda i: (i, 0)),
        compiler_params=pltpu.CompilerParams(
            dimension_semantics=("parallel",),
            vmem_limit_bytes=vmem_limit),
        cost_estimate=cost,
    )


def actor_discrete_ppo_forward(params, state, *, batch_tile=512):
    """Equivalent of ActorDiscretePPO.forward: concatenated per-head logits."""
    B, state_dim = state.shape
    w1, b1 = params["main_w1"], params["main_b1"]
    w2, b2 = params["main_w2"], params["main_b2"]
    wh1, bh1 = params["heads_w1"], params["heads_b1"]
    wh2, bh2 = params["heads_w2"], params["heads_b2"]
    out_total = params["out_dim"]       # sum(action_dim)
    out_pad = wh2.shape[1]              # lane-padded (multiple of 128)
    mid = w1.shape[1]
    nh_mid = wh1.shape[1]

    # Batch tile: sublane-aligned, at most `batch_tile` rows, and no larger
    # than half the rounded batch so the "parallel" grid gets >= 2 steps
    # (both v7x TensorCores busy) whenever B allows it.
    tb = min(_round_up(batch_tile, _SUBLANE),
             max(_SUBLANE, _round_up(pl.cdiv(B, 2), _SUBLANE)))
    b_pad = _round_up(B, tb)

    x = state.astype(jnp.bfloat16)
    if b_pad != B:                      # skip the pad copy when tile-aligned
        x = jnp.pad(x, ((0, b_pad - B), (0, 0)))

    # Scoped-VMEM budget: weights (x2 in case single-buffering is ignored),
    # double-buffered activation/output tiles, f32 intermediates, headroom.
    def _nbytes(a):
        return a.size * a.dtype.itemsize

    all_params = (w1, b1, w2, b2, wh1, bh1, wh2, bh2)
    vmem_need = (2 * sum(_nbytes(a) for a in all_params)
                 + 2 * tb * state_dim * 2          # bf16 input tiles
                 + 2 * tb * out_pad * 4            # f32 output tiles
                 + 2 * tb * (mid + nh_mid) * 4     # f32 intermediates
                 + (4 << 20))                      # headroom
    vmem_limit = int(min(max(vmem_need, 32 << 20), 100 << 20))

    flops = 2 * b_pad * (state_dim * mid + mid * mid
                         + mid * nh_mid + nh_mid * out_pad)
    bytes_accessed = (b_pad * state_dim * 2 + b_pad * out_pad * 4
                      + sum(_nbytes(a) for a in all_params))
    cost = pl.CostEstimate(flops=int(flops), transcendentals=0,
                           bytes_accessed=int(bytes_accessed))

    weights = (w1, w2, wh1, wh2)
    biases = (b1, b2, bh1, bh2)
    try:
        out = _build_call(tb, b_pad, state_dim, weights, biases, out_pad,
                          vmem_limit, cost, single_buffer_weights=True)(
            x, w1, b1, w2, b2, wh1, bh1, wh2, bh2)
    except Exception:
        # pl.Buffered(1) not supported by this JAX/Mosaic build: fall back to
        # default pipelining (correct, just 2x weight VMEM).
        out = _build_call(tb, b_pad, state_dim, weights, biases, out_pad,
                          vmem_limit, cost, single_buffer_weights=False)(
            x, w1, b1, w2, b2, wh1, bh1, wh2, bh2)

    # Slice off batch padding and the lane padding of the output slab.
    # (Callers that can consume the padded slab may skip this slice.)
    return out[:B, :out_total]


def _init_linear(key, in_dim, out_dim):
    """Deterministic init mimicking torch.nn.Linear (uniform +-1/sqrt(fan_in)).

    Weight returned as [in_dim, out_dim] (transposed vs. PyTorch's [out, in]).
    """
    k_w, k_b = jax.random.split(key)
    bound = 1.0 / math.sqrt(in_dim)
    w = jax.random.uniform(k_w, (in_dim, out_dim), jnp.float32, -bound, bound)
    b = jax.random.uniform(k_b, (1, out_dim), jnp.float32, -bound, bound)
    return w, b


def init_actor_params(key, mid_dim, state_dim, action_dim):
    """Init params; head weights pre-packed (stacked / block-diag), bf16-cast."""
    keys = jax.random.split(key, 2 + 2 * len(action_dim))
    main_w1, main_b1 = _init_linear(keys[0], state_dim, mid_dim)
    main_w2, main_b2 = _init_linear(keys[1], mid_dim, mid_dim)

    n_heads = len(action_dim)
    out_total = int(sum(action_dim))
    out_pad = _round_up(out_total, _LANE)   # lane-dense output slab

    wh1_list, bh1_list, heads_unpacked = [], [], []
    heads_w2 = jnp.zeros((n_heads * mid_dim, out_pad), jnp.float32)
    heads_b2 = jnp.zeros((1, out_pad), jnp.float32)
    col = 0
    for i, a_d in enumerate(action_dim):
        wh1, bh1 = _init_linear(keys[2 + 2 * i], mid_dim, mid_dim)
        wh2, bh2 = _init_linear(keys[3 + 2 * i], mid_dim, a_d)
        wh1_list.append(wh1)
        bh1_list.append(bh1)
        heads_w2 = heads_w2.at[i * mid_dim:(i + 1) * mid_dim, col:col + a_d].set(wh2)
        heads_b2 = heads_b2.at[:, col:col + a_d].set(bh2)
        heads_unpacked.append((wh1, bh1, wh2, bh2))
        col += a_d

    heads_w1 = jnp.concatenate(wh1_list, axis=1)   # [mid, n_heads*mid]
    heads_b1 = jnp.concatenate(bh1_list, axis=1)   # [1,   n_heads*mid]

    return {
        # Kernel operands: matmul weights pre-cast to bf16, biases kept f32.
        "main_w1": main_w1.astype(jnp.bfloat16), "main_b1": main_b1,
        "main_w2": main_w2.astype(jnp.bfloat16), "main_b2": main_b2,
        "heads_w1": heads_w1.astype(jnp.bfloat16),
        "heads_b1": heads_b1,
        "heads_w2": heads_w2.astype(jnp.bfloat16),   # block-diag [n_heads*mid, out_pad]
        "heads_b2": heads_b2,                        # [1, out_pad]
        "out_dim": out_total,
        # f32 originals, only used by the pure-JAX reference check.
        "ref_main": (main_w1, main_b1, main_w2, main_b2),
        "heads_unpacked": heads_unpacked,
    }


if __name__ == "__main__":
    # Small shapes consistent with the module.
    batch = 2
    state_dim = 16
    mid_dim = 32
    action_dim = (3, 4)   # Multi_Discrete heads -> concatenated output dim = 7

    key = jax.random.PRNGKey(0)
    k_params, k_state = jax.random.split(key)

    params = init_actor_params(k_params, mid_dim, state_dim, action_dim)
    state = jax.random.normal(k_state, (batch, state_dim), jnp.float32)

    result = jax.block_until_ready(actor_discrete_ppo_forward(params, state))

    assert result.shape == (batch, sum(action_dim)), result.shape
    assert result.dtype == jnp.float32

    # Pure-JAX f32 reference using the ORIGINAL (unpacked, per-head) structure.
    def ref_forward(params, x):
        w1, b1, w2, b2 = params["ref_main"]
        h = jnp.maximum(x @ w1 + b1, 0.0)
        h = jnp.maximum(h @ w2 + b2, 0.0)
        outs = []
        for (wh1, bh1, wh2, bh2) in params["heads_unpacked"]:
            hh = jnp.maximum(h @ wh1 + bh1, 0.0)
            outs.append(hh @ wh2 + bh2)
        return jnp.concatenate(outs, axis=1)

    ref = ref_forward(params, state)
    # bf16 matmul operands with f32 accumulation vs. pure-f32 reference:
    # loosened tolerance per the review.
    assert jnp.allclose(result, ref, atol=5e-2, rtol=5e-2), \
        float(jnp.max(jnp.abs(result - ref)))

    print("KERNEL_OK")
</pallas_src>

<mosaic_0001>
module attributes {stable_mosaic.version = 11 : i64} {
  func.func @_actor_fused_kernel(%arg0: i32, %arg1: memref<8x16xbf16, #tpu.memory_space<vmem>>, %arg2: memref<16x32xbf16, #tpu.memory_space<vmem>>, %arg3: memref<1x32xf32, #tpu.memory_space<vmem>>, %arg4: memref<32x32xbf16, #tpu.memory_space<vmem>>, %arg5: memref<1x32xf32, #tpu.memory_space<vmem>>, %arg6: memref<32x64xbf16, #tpu.memory_space<vmem>>, %arg7: memref<1x64xf32, #tpu.memory_space<vmem>>, %arg8: memref<64x128xbf16, #tpu.memory_space<vmem>>, %arg9: memref<1x128xf32, #tpu.memory_space<vmem>>, %arg10: memref<8x128xf32, #tpu.memory_space<vmem>>) attributes {dimension_semantics = [#tpu.dimension_semantics<parallel>], iteration_bounds = array<i64: 1>, scalar_prefetch = 0 : i64, scratch_operands = 0 : i64, tpu.core_type = #tpu.core_type<tc>, window_params = [{transform_indices = @transform_0, window_bounds = array<i64: 8, 16>}, {pipeline_mode = #tpu.pipeline_mode<synchronous>, transform_indices = @transform_1, window_bounds = array<i64: 16, 32>}, {pipeline_mode = #tpu.pipeline_mode<synchronous>, transform_indices = @transform_2, window_bounds = array<i64: 1, 32>}, {pipeline_mode = #tpu.pipeline_mode<synchronous>, transform_indices = @transform_3, window_bounds = array<i64: 32, 32>}, {pipeline_mode = #tpu.pipeline_mode<synchronous>, transform_indices = @transform_4, window_bounds = array<i64: 1, 32>}, {pipeline_mode = #tpu.pipeline_mode<synchronous>, transform_indices = @transform_5, window_bounds = array<i64: 32, 64>}, {pipeline_mode = #tpu.pipeline_mode<synchronous>, transform_indices = @transform_6, window_bounds = array<i64: 1, 64>}, {pipeline_mode = #tpu.pipeline_mode<synchronous>, transform_indices = @transform_7, window_bounds = array<i64: 64, 128>}, {pipeline_mode = #tpu.pipeline_mode<synchronous>, transform_indices = @transform_8, window_bounds = array<i64: 1, 128>}, {transform_indices = @transform_9, window_bounds = array<i64: 8, 128>}]} {
    %c0 = arith.constant 0 : index
    %c0_0 = arith.constant 0 : index
    %0 = vector.load %arg1[%c0, %c0_0] : memref<8x16xbf16, #tpu.memory_space<vmem>>, vector<8x16xbf16>
    %c0_1 = arith.constant 0 : index
    %c0_2 = arith.constant 0 : index
    %1 = vector.load %arg2[%c0_1, %c0_2] : memref<16x32xbf16, #tpu.memory_space<vmem>>, vector<16x32xbf16>
    %cst = arith.constant dense<0.000000e+00> : vector<8x32xf32>
    %2 = tpu.matmul %0, %1, %cst {dimension_numbers = #tpu.dot_dimension_numbers<[1], [0], [0], [1], [0, 0, 1, 1], [], []>} : vector<8x16xbf16>, vector<16x32xbf16>, vector<8x32xf32> -> vector<8x32xf32>
    %c0_3 = arith.constant 0 : index
    %c0_4 = arith.constant 0 : index
    %3 = vector.load %arg3[%c0_3, %c0_4] : memref<1x32xf32, #tpu.memory_space<vmem>>, vector<1x32xf32>
    %4 = vector.broadcast %3 : vector<1x32xf32> to vector<8x32xf32>
    %5 = arith.addf %2, %4 : vector<8x32xf32>
    %cst_5 = arith.constant 0.000000e+00 : f32
    %6 = vector.broadcast %cst_5 : f32 to vector<8x32xf32>
    %7 = arith.maximumf %5, %6 : vector<8x32xf32>
    %8 = arith.truncf %7 : vector<8x32xf32> to vector<8x32xbf16>
    %c0_6 = arith.constant 0 : index
    %c0_7 = arith.constant 0 : index
    %9 = vector.load %arg4[%c0_6, %c0_7] : memref<32x32xbf16, #tpu.memory_space<vmem>>, vector<32x32xbf16>
    %cst_8 = arith.constant dense<0.000000e+00> : vector<8x32xf32>
    %10 = tpu.matmul %8, %9, %cst_8 {dimension_numbers = #tpu.dot_dimension_numbers<[1], [0], [0], [1], [0, 0, 1, 1], [], []>} : vector<8x32xbf16>, vector<32x32xbf16>, vector<8x32xf32> -> vector<8x32xf32>
    %c0_9 = arith.constant 0 : index
    %c0_10 = arith.constant 0 : index
    %11 = vector.load %arg5[%c0_9, %c0_10] : memref<1x32xf32, #tpu.memory_space<vmem>>, vector<1x32xf32>
    %12 = vector.broadcast %11 : vector<1x32xf32> to vector<8x32xf32>
    %13 = arith.addf %10, %12 : vector<8x32xf32>
    %cst_11 = arith.constant 0.000000e+00 : f32
    %14 = vector.broadcast %cst_11 : f32 to vector<8x32xf32>
    %15 = arith.maximumf %13, %14 : vector<8x32xf32>
    %16 = arith.truncf %15 : vector<8x32xf32> to vector<8x32xbf16>
    %c0_12 = arith.constant 0 : index
    %c0_13 = arith.constant 0 : index
    %17 = vector.load %arg6[%c0_12, %c0_13] : memref<32x64xbf16, #tpu.memory_space<vmem>>, vector<32x64xbf16>
    %cst_14 = arith.constant dense<0.000000e+00> : vector<8x64xf32>
    %18 = tpu.matmul %16, %17, %cst_14 {dimension_numbers = #tpu.dot_dimension_numbers<[1], [0], [0], [1], [0, 0, 1, 1], [], []>} : vector<8x32xbf16>, vector<32x64xbf16>, vector<8x64xf32> -> vector<8x64xf32>
    %c0_15 = arith.constant 0 : index
    %c0_16 = arith.constant 0 : index
    %19 = vector.load %arg7[%c0_15, %c0_16] : memref<1x64xf32, #tpu.memory_space<vmem>>, vector<1x64xf32>
    %20 = vector.broadcast %19 : vector<1x64xf32> to vector<8x64xf32>
    %21 = arith.addf %18, %20 : vector<8x64xf32>
    %cst_17 = arith.constant 0.000000e+00 : f32
    %22 = vector.broadcast %cst_17 : f32 to vector<8x64xf32>
    %23 = arith.maximumf %21, %22 : vector<8x64xf32>
    %24 = arith.truncf %23 : vector<8x64xf32> to vector<8x64xbf16>
    %c0_18 = arith.constant 0 : index
    %c0_19 = arith.constant 0 : index
    %25 = vector.load %arg8[%c0_18, %c0_19] : memref<64x128xbf16, #tpu.memory_space<vmem>>, vector<64x128xbf16>
    %cst_20 = arith.constant dense<0.000000e+00> : vector<8x128xf32>
    %26 = tpu.matmul %24, %25, %cst_20 {dimension_numbers = #tpu.dot_dimension_numbers<[1], [0], [0], [1], [0, 0, 1, 1], [], []>} : vector<8x64xbf16>, vector<64x128xbf16>, vector<8x128xf32> -> vector<8x128xf32>
    %c0_21 = arith.constant 0 : index
    %c0_22 = arith.constant 0 : index
    %27 = vector.load %arg9[%c0_21, %c0_22] : memref<1x128xf32, #tpu.memory_space<vmem>>, vector<1x128xf32>
    %28 = vector.broadcast %27 : vector<1x128xf32> to vector<8x128xf32>
    %29 = arith.addf %26, %28 : vector<8x128xf32>
    %c0_23 = arith.constant 0 : index
    %c0_24 = arith.constant 0 : index
    %30 = vector.load %arg10[%c0_23, %c0_24] : memref<8x128xf32, #tpu.memory_space<vmem>>, vector<8x128xf32>
    tpu.vector_store %arg10[%c0_23, %c0_24], %29 {strides = array<i32>} : memref<8x128xf32, #tpu.memory_space<vmem>>, vector<8x128xf32>,
    return
  }
  func.func @transform_0(%arg0: i32) -> (i32, i32) {
    %c0_i32 = arith.constant 0 : i32
    %c0_i32_0 = arith.constant 0 : i32
    return %arg0, %c0_i32 : i32, i32
  }
  func.func @transform_1(%arg0: i32) -> (i32, i32) {
    %c0_i32 = arith.constant 0 : i32
    %c0_i32_0 = arith.constant 0 : i32
    %c0_i32_1 = arith.constant 0 : i32
    return %c0_i32, %c0_i32_0 : i32, i32
  }
  func.func @transform_2(%arg0: i32) -> (i32, i32) {
    %c0_i32 = arith.constant 0 : i32
    %c0_i32_0 = arith.constant 0 : i32
    %c0_i32_1 = arith.constant 0 : i32
    return %c0_i32, %c0_i32_0 : i32, i32
  }
  func.func @transform_3(%arg0: i32) -> (i32, i32) {
    %c0_i32 = arith.constant 0 : i32
    %c0_i32_0 = arith.constant 0 : i32
    %c0_i32_1 = arith.constant 0 : i32
    return %c0_i32, %c0_i32_0 : i32, i32
  }
  func.func @transform_4(%arg0: i32) -> (i32, i32) {
    %c0_i32 = arith.constant 0 : i32
    %c0_i32_0 = arith.constant 0 : i32
    %c0_i32_1 = arith.constant 0 : i32
    return %c0_i32, %c0_i32_0 : i32, i32
  }
  func.func @transform_5(%arg0: i32) -> (i32, i32) {
    %c0_i32 = arith.constant 0 : i32
    %c0_i32_0 = arith.constant 0 : i32
    %c0_i32_1 = arith.constant 0 : i32
    return %c0_i32, %c0_i32_0 : i32, i32
  }
  func.func @transform_6(%arg0: i32) -> (i32, i32) {
    %c0_i32 = arith.constant 0 : i32
    %c0_i32_0 = arith.constant 0 : i32
    %c0_i32_1 = arith.constant 0 : i32
    return %c0_i32, %c0_i32_0 : i32, i32
  }
  func.func @transform_7(%arg0: i32) -> (i32, i32) {
    %c0_i32 = arith.constant 0 : i32
    %c0_i32_0 = arith.constant 0 : i32
    %c0_i32_1 = arith.constant 0 : i32
    return %c0_i32, %c0_i32_0 : i32, i32
  }
  func.func @transform_8(%arg0: i32) -> (i32, i32) {
    %c0_i32 = arith.constant 0 : i32
    %c0_i32_0 = arith.constant 0 : i32
    %c0_i32_1 = arith.constant 0 : i32
    return %c0_i32, %c0_i32_0 : i32, i32
  }
  func.func @transform_9(%arg0: i32) -> (i32, i32) {
    %c0_i32 = arith.constant 0 : i32
    %c0_i32_0 = arith.constant 0 : i32
    return %arg0, %c0_i32 : i32, i32
  }
}

module attributes {stable_mosaic.version = 11 : i64} {
  func.func @_actor_fused_kernel(%arg0: i32, %arg1: memref<8x16xbf16, #tpu.memory_space<vmem>>, %arg2: memref<16x32xbf16, #tpu.memory_space<vmem>>, %arg3: memref<1x32xf32, #tpu.memory_space<vmem>>, %arg4: memref<32x32xbf16, #tpu.memory_space<vmem>>, %arg5: memref<1x32xf32, #tpu.memory_space<vmem>>, %arg6: memref<32x64xbf16, #tpu.memory_space<vmem>>, %arg7: memref<1x64xf32, #tpu.memory_space<vmem>>, %arg8: memref<64x128xbf16, #tpu.memory_space<vmem>>, %arg9: memref<1x128xf32, #tpu.memory_space<vmem>>, %arg10: memref<8x128xf32, #tpu.memory_space<vmem>>) attributes {dimension_semantics = [#tpu.dimension_semantics<parallel>], iteration_bounds = array<i64: 1>, scalar_prefetch = 0 : i64, scratch_operands = 0 : i64, tpu.core_type = #tpu.core_type<tc>, window_params = [{transform_indices = @transform_0, window_bounds = array<i64: 8, 16>}, {pipeline_mode = #tpu.pipeline_mode<synchronous>, transform_indices = @transform_1, window_bounds = array<i64: 16, 32>}, {pipeline_mode = #tpu.pipeline_mode<synchronous>, transform_indices = @transform_2, window_bounds = array<i64: 1, 32>}, {pipeline_mode = #tpu.pipeline_mode<synchronous>, transform_indices = @transform_3, window_bounds = array<i64: 32, 32>}, {pipeline_mode = #tpu.pipeline_mode<synchronous>, transform_indices = @transform_4, window_bounds = array<i64: 1, 32>}, {pipeline_mode = #tpu.pipeline_mode<synchronous>, transform_indices = @transform_5, window_bounds = array<i64: 32, 64>}, {pipeline_mode = #tpu.pipeline_mode<synchronous>, transform_indices = @transform_6, window_bounds = array<i64: 1, 64>}, {pipeline_mode = #tpu.pipeline_mode<synchronous>, transform_indices = @transform_7, window_bounds = array<i64: 64, 128>}, {pipeline_mode = #tpu.pipeline_mode<synchronous>, transform_indices = @transform_8, window_bounds = array<i64: 1, 128>}, {transform_indices = @transform_9, window_bounds = array<i64: 8, 128>}]} {
    %c0 = arith.constant 0 : index
    %c0_0 = arith.constant 0 : index
    %0 = vector.load %arg1[%c0, %c0_0] : memref<8x16xbf16, #tpu.memory_space<vmem>>, vector<8x16xbf16>
    %c0_1 = arith.constant 0 : index
    %c0_2 = arith.constant 0 : index
    %1 = vector.load %arg2[%c0_1, %c0_2] : memref<16x32xbf16, #tpu.memory_space<vmem>>, vector<16x32xbf16>
    %cst = arith.constant dense<0.000000e+00> : vector<8x32xf32>
    %2 = tpu.matmul %0, %1, %cst {dimension_numbers = #tpu.dot_dimension_numbers<[1], [0], [0], [1], [0, 0, 1, 1], [], []>} : vector<8x16xbf16>, vector<16x32xbf16>, vector<8x32xf32> -> vector<8x32xf32>
    %c0_3 = arith.constant 0 : index
    %c0_4 = arith.constant 0 : index
    %3 = vector.load %arg3[%c0_3, %c0_4] : memref<1x32xf32, #tpu.memory_space<vmem>>, vector<1x32xf32>
    %4 = vector.broadcast %3 : vector<1x32xf32> to vector<8x32xf32>
    %5 = arith.addf %2, %4 : vector<8x32xf32>
    %cst_5 = arith.constant 0.000000e+00 : f32
    %6 = vector.broadcast %cst_5 : f32 to vector<8x32xf32>
    %7 = arith.maximumf %5, %6 : vector<8x32xf32>
    %8 = arith.truncf %7 : vector<8x32xf32> to vector<8x32xbf16>
    %c0_6 = arith.constant 0 : index
    %c0_7 = arith.constant 0 : index
    %9 = vector.load %arg4[%c0_6, %c0_7] : memref<32x32xbf16, #tpu.memory_space<vmem>>, vector<32x32xbf16>
    %cst_8 = arith.constant dense<0.000000e+00> : vector<8x32xf32>
    %10 = tpu.matmul %8, %9, %cst_8 {dimension_numbers = #tpu.dot_dimension_numbers<[1], [0], [0], [1], [0, 0, 1, 1], [], []>} : vector<8x32xbf16>, vector<32x32xbf16>, vector<8x32xf32> -> vector<8x32xf32>
    %c0_9 = arith.constant 0 : index
    %c0_10 = arith.constant 0 : index
    %11 = vector.load %arg5[%c0_9, %c0_10] : memref<1x32xf32, #tpu.memory_space<vmem>>, vector<1x32xf32>
    %12 = vector.broadcast %11 : vector<1x32xf32> to vector<8x32xf32>
    %13 = arith.addf %10, %12 : vector<8x32xf32>
    %cst_11 = arith.constant 0.000000e+00 : f32
    %14 = vector.broadcast %cst_11 : f32 to vector<8x32xf32>
    %15 = arith.maximumf %13, %14 : vector<8x32xf32>
    %16 = arith.truncf %15 : vector<8x32xf32> to vector<8x32xbf16>
    %c0_12 = arith.constant 0 : index
    %c0_13 = arith.constant 0 : index
    %17 = vector.load %arg6[%c0_12, %c0_13] : memref<32x64xbf16, #tpu.memory_space<vmem>>, vector<32x64xbf16>
    %cst_14 = arith.constant dense<0.000000e+00> : vector<8x64xf32>
    %18 = tpu.matmul %16, %17, %cst_14 {dimension_numbers = #tpu.dot_dimension_numbers<[1], [0], [0], [1], [0, 0, 1, 1], [], []>} : vector<8x32xbf16>, vector<32x64xbf16>, vector<8x64xf32> -> vector<8x64xf32>
    %c0_15 = arith.constant 0 : index
    %c0_16 = arith.constant 0 : index
    %19 = vector.load %arg7[%c0_15, %c0_16] : memref<1x64xf32, #tpu.memory_space<vmem>>, vector<1x64xf32>
    %20 = vector.broadcast %19 : vector<1x64xf32> to vector<8x64xf32>
    %21 = arith.addf %18, %20 : vector<8x64xf32>
    %cst_17 = arith.constant 0.000000e+00 : f32
    %22 = vector.broadcast %cst_17 : f32 to vector<8x64xf32>
    %23 = arith.maximumf %21, %22 : vector<8x64xf32>
    %24 = arith.truncf %23 : vector<8x64xf32> to vector<8x64xbf16>
    %c0_18 = arith.constant 0 : index
    %c0_19 = arith.constant 0 : index
    %25 = vector.load %arg8[%c0_18, %c0_19] : memref<64x128xbf16, #tpu.memory_space<vmem>>, vector<64x128xbf16>
    %cst_20 = arith.constant dense<0.000000e+00> : vector<8x128xf32>
    %26 = tpu.matmul %24, %25, %cst_20 {dimension_numbers = #tpu.dot_dimension_numbers<[1], [0], [0], [1], [0, 0, 1, 1], [], []>} : vector<8x64xbf16>, vector<64x128xbf16>, vector<8x128xf32> -> vector<8x128xf32>
    %c0_21 = arith.constant 0 : index
    %c0_22 = arith.constant 0 : index
    %27 = vector.load %arg9[%c0_21, %c0_22] : memref<1x128xf32, #tpu.memory_space<vmem>>, vector<1x128xf32>
    %28 = vector.broadcast %27 : vector<1x128xf32> to vector<8x128xf32>
    %29 = arith.addf %26, %28 : vector<8x128xf32>
    %c0_23 = arith.constant 0 : index
    %c0_24 = arith.constant 0 : index
    %30 = vector.load %arg10[%c0_23, %c0_24] : memref<8x128xf32, #tpu.memory_space<vmem>>, vector<8x128xf32>
    tpu.vector_store %arg10[%c0_23, %c0_24], %29 {strides = array<i32>} : memref<8x128xf32, #tpu.memory_space<vmem>>, vector<8x128xf32>,
    return
  }
  func.func @transform_0(%arg0: i32) -> (i32, i32) {
    %c0_i32 = arith.constant 0 : i32
    %c0_i32_0 = arith.constant 0 : i32
    return %arg0, %c0_i32 : i32, i32
  }
  func.func @transform_1(%arg0: i32) -> (i32, i32) {
    %c0_i32 = arith.constant 0 : i32
    %c0_i32_0 = arith.constant 0 : i32
    %c0_i32_1 = arith.constant 0 : i32
    return %c0_i32, %c0_i32_0 : i32, i32
  }
  func.func @transform_2(%arg0: i32) -> (i32, i32) {
    %c0_i32 = arith.constant 0 : i32
    %c0_i32_0 = arith.constant 0 : i32
    %c0_i32_1 = arith.constant 0 : i32
    return %c0_i32, %c0_i32_0 : i32, i32
  }
  func.func @transform_3(%arg0: i32) -> (i32, i32) {
    %c0_i32 = arith.constant 0 : i32
    %c0_i32_0 = arith.constant 0 : i32
    %c0_i32_1 = arith.constant 0 : i32
    return %c0_i32, %c0_i32_0 : i32, i32
  }
  func.func @transform_4(%arg0: i32) -> (i32, i32) {
    %c0_i32 = arith.constant 0 : i32
    %c0_i32_0 = arith.constant 0 : i32
    %c0_i32_1 = arith.constant 0 : i32
    return %c0_i32, %c0_i32_0 : i32, i32
  }
  func.func @transform_5(%arg0: i32) -> (i32, i32) {
    %c0_i32 = arith.constant 0 : i32
    %c0_i32_0 = arith.constant 0 : i32
    %c0_i32_1 = arith.constant 0 : i32
    return %c0_i32, %c0_i32_0 : i32, i32
  }
  func.func @transform_6(%arg0: i32) -> (i32, i32) {
    %c0_i32 = arith.constant 0 : i32
    %c0_i32_0 = arith.constant 0 : i32
    %c0_i32_1 = arith.constant 0 : i32
    return %c0_i32, %c0_i32_0 : i32, i32
  }
  func.func @transform_7(%arg0: i32) -> (i32, i32) {
    %c0_i32 = arith.constant 0 : i32
    %c0_i32_0 = arith.constant 0 : i32
    %c0_i32_1 = arith.constant 0 : i32
    return %c0_i32, %c0_i32_0 : i32, i32
  }
  func.func @transform_8(%arg0: i32) -> (i32, i32) {
    %c0_i32 = arith.constant 0 : i32
    %c0_i32_0 = arith.constant 0 : i32
    %c0_i32_1 = arith.constant 0 : i32
    return %c0_i32, %c0_i32_0 : i32, i32
  }
  func.func @transform_9(%arg0: i32) -> (i32, i32) {
    %c0_i32 = arith.constant 0 : i32
    %c0_i32_0 = arith.constant 0 : i32
    return %arg0, %c0_i32 : i32, i32
  }
}

</mosaic_0001>

<bundles_post_ra>
// kernel: tpu_custom_call.1
= control target key start
LH: loop header
LB: loop body
LE: loop exit
PB: predicated region body
PF: predicated region fallthrough
CT: control target
= control target key end

     0   :  { %14 = vsyncpa [#allocation3], 0  ;;  %s739_s0 = inlined_call_operand.hbm [shape: bf16[8,16], index: 0, kind: input, shape index: {}]   ;;  %s740_s1 = inlined_call_operand.hbm [shape: bf16[16,32], index: 1, kind: input, shape index: {}]   ;;  %s741_s2 = inlined_call_operand.vmem [shape: f32[1,32], index: 2, kind: input, shape index: {}]   ;;  %s742_s3 = inlined_call_operand.hbm [shape: bf16[32,32], index: 3, kind: input, shape index: {}]   ;;  %s743_s4 = inlined_call_operand.vmem [shape: f32[1,32], index: 4, kind: input, shape index: {}]   ;;  %s744_s5 = inlined_call_operand.vmem [shape: bf16[32,64], index: 5, kind: input, shape index: {}]   ;;  %s745_s6 = inlined_call_operand.vmem [shape: f32[1,64], index: 6, kind: input, shape index: {}]   ;;  %s746_s7 = inlined_call_operand.hbm [shape: bf16[64,128], index: 7, kind: input, shape index: {}]   ;;  %s747_s8 = inlined_call_operand.vmem [shape: f32[1,128], index: 8, kind: input, shape index: {}]   ;;  %s748_s9 = inlined_call_operand.hbm [shape: f32[8,128], index: 9, kind: output, shape index: {}]  }
   0x1   :  { %15 = vsyncpa [#allocation6], 0 }
   0x2   :  { %16 = vsyncpa [#allocation9], 0 }
   0x3   :  { %17 = vsyncpa [#allocation4], 0  ;;  %s587_s30 = smov [#allocation5]   ;;  %s469_s13 = scalar_lea.hbm %s740_s1, 128 }
   0x4   :  { %s33_s10 = sshll.u32 %s587_s30, 4  ;;  %p470_p0 = scmp.ne.s32.totalorder %s740_s1, %s469_s13  ;;  %s34_s10 = int_to_ptr.vmem [resolvable:$true] %s33_s10 }
   0x5   :  { %p473_p1 = scmp.lt.u32.totalorder %s469_s13, %s740_s1 }
   0x7   :  { %p475_p2 = pnand %p473_p1, %p470_p0 }
   0x9   :  { %478 = shalt.err (!%p475_p2)
}
   0xa   :  { %s479_s18 = scalar_lea.vmem %s34_s10, 128  ;;  %p484_p4 = scmp.lt.s32.totalorder %s34_s10, %s34_s10 }
   0xb   :  { %p480_p3 = scmp.ne.s32.totalorder %s34_s10, %s479_s18  ;;  %p485_p5 = scmp.lt.s32.totalorder %s479_s18, %s479_s18 }
   0xd   :  { %p486_p6 = por %p485_p5, %p484_p4 }
   0xf   :  { %p487_p7 = pnand %p486_p6, %p480_p3 }
  0x11   :  { %490 = shalt.err (!%p487_p7)
}
  0x12   :  { %s588_s19 = smov 64   ;;  %s589_s20 = smov 4  }
  0x13   :  { %39 = dma.hbm_to_vmem [thread:$0]  %s740_s1, 128, %s34_s10, [#allocation6], %s588_s19, %s588_s19, %s589_s20  }
  0x14   :  { %s590_s23 = smov [#allocation2]   ;;  %s591_s25 = smov [#allocation7]  }
  0x15   :  { %s24_s24 = sshll.u32 %s590_s23, 4  ;;  %s47_s26 = sshll.u32 %s591_s25, 4  ;;  %s25_s24 = int_to_ptr.vmem [resolvable:$true] %s24_s24  ;;  %s48_s26 = int_to_ptr.vmem [resolvable:$true] %s47_s26 }
  0x16   :  { %s491_s29 = scalar_lea.hbm %s739_s0, 64 }
  0x17   :  { %p492_p8 = scmp.ne.s32.totalorder %s739_s0, %s491_s29  ;;  %p495_p9 = scmp.lt.u32.totalorder %s491_s29, %s739_s0 }
  0x19   :  { %p497_p10 = pnand %p495_p9, %p492_p8 }
  0x1b   :  { %500 = shalt.err (!%p497_p10)
}
  0x1c   :  { %s501_s1 = scalar_lea.vmem %s25_s24, 64  ;;  %p506_p12 = scmp.lt.s32.totalorder %s25_s24, %s25_s24 }
  0x1d   :  { %p502_p11 = scmp.ne.s32.totalorder %s25_s24, %s501_s1  ;;  %p507_p13 = scmp.lt.s32.totalorder %s501_s1, %s501_s1 }
  0x1f   :  { %p508_p0 = por %p507_p13, %p506_p12 }
  0x21   :  { %p509_p1 = pnand %p508_p0, %p502_p11 }
  0x23   :  { %512 = shalt.err (!%p509_p1)
}
  0x24   :  { %27 = dma.hbm_to_vmem [thread:$0]  %s739_s0, 64, %s25_s24, [#allocation3]  }
  0x25   :  { %s513_s17 = scalar_lea.hbm %s742_s3, 256 }
  0x26   :  { %p514_p2 = scmp.ne.s32.totalorder %s742_s3, %s513_s17  ;;  %p517_p3 = scmp.lt.u32.totalorder %s513_s17, %s742_s3 }
  0x28   :  { %p519_p4 = pnand %p517_p3, %p514_p2 }
  0x2a   :  { %522 = shalt.err (!%p519_p4)
}
  0x2b   :  { %s523_s25 = scalar_lea.vmem %s48_s26, 256  ;;  %p528_p6 = scmp.lt.s32.totalorder %s48_s26, %s48_s26 }
  0x2c   :  { %p524_p5 = scmp.ne.s32.totalorder %s48_s26, %s523_s25  ;;  %p529_p7 = scmp.lt.s32.totalorder %s523_s25, %s523_s25 }
  0x2e   :  { %p530_p8 = por %p529_p7, %p528_p6 }
  0x30   :  { %p531_p9 = pnand %p530_p8, %p524_p5 }
  0x32   :  { %534 = shalt.err (!%p531_p9)
}
  0x33   :  { %53 = dma.hbm_to_vmem [thread:$0]  %s742_s3, 256, %s48_s26, [#allocation6], %s588_s19, %s588_s19, %s589_s20  }
  0x34   :  { %s592_s27 = smov [#allocation8]   ;;  %s535_s11 = scalar_lea.hbm %s746_s7, 512 }
  0x35   :  { %s65_s28 = sshll.u32 %s592_s27, 4  ;;  %p536_p10 = scmp.ne.s32.totalorder %s746_s7, %s535_s11  ;;  %s66_s28 = int_to_ptr.vmem [resolvable:$true] %s65_s28 }
  0x36   :  { %p539_p11 = scmp.lt.u32.totalorder %s535_s11, %s746_s7 }
  0x38   :  { %p541_p12 = pnand %p539_p11, %p536_p10 }
  0x3a   :  { %544 = shalt.err (!%p541_p12)
}
  0x3b   :  { %s545_s14 = scalar_lea.vmem %s66_s28, 512  ;;  %p550_p0 = scmp.lt.s32.totalorder %s66_s28, %s66_s28 }
  0x3c   :  { %p546_p13 = scmp.ne.s32.totalorder %s66_s28, %s545_s14  ;;  %p551_p1 = scmp.lt.s32.totalorder %s545_s14, %s545_s14 }
  0x3e   :  { %p552_p2 = por %p551_p1, %p550_p0 }
  0x40   :  { %p553_p3 = pnand %p552_p2, %p546_p13 }
  0x42   :  { %556 = shalt.err (!%p553_p3)
}
  0x43   :  { %71 = dma.hbm_to_vmem [thread:$0]  %s746_s7, 512, %s66_s28, [#allocation9], %s588_s19, %s588_s19, %s589_s20  }
  0x44   :  { %579 = dma.done.wait [#allocation3], 64  }
  0x45   :  { %580 = vsyncadd [#allocation3], 4294967232 }
  0x46   :  { %581 = dma.done.wait [#allocation6], 384  }
  0x47   :  { %582 = vsyncadd [#allocation6], 4294966912 }
  0x48   :  { %583 = dma.done.wait [#allocation9], 512  }
  0x49   :  { %584 = vsyncadd [#allocation9], 4294966784  ;;  %v593_v0 = vmov 0.0   ;;  %vm594_vm0 = vmmov 0   ;;  %v460_v1 = vld [vmem:[#allocation5] sm:$0xff]   ;;  %vm103_vm1 = vcmask 130048  }
  0x4a   :  { %417 = vmatprep.subr.bf16.mxu0 %v593_v0  ;;  %419 = vmatprep.mubr.msk.bf16.mxu0 %vm594_vm0, %v593_v0  ;;  %v87_v2 = vld [vmem:[#allocation2] sm:$0xf]  ;;  %v461_v3 = vld [vmem:[#allocation7] sm:$0xff]   ;;  %v462_v4 = vld [vmem:[#allocation7 + $0x8] sm:$0xff]   ;;  %vm172_vm2 = vcmask 261120   ;;  %vm325_vm3 = vcmask 523264  }
  0x4b   :  { %439 = vmatprep.subr.bf16.mxu1 %v593_v0  ;;  %447 = vmatprep.mubr.msk.bf16.mxu1 %vm594_vm0, %v593_v0  ;;  %v387_v5 = vld [vmem:[%s741_s2] ss:$0 sm:$0xff]  ;;  %v464_v14 = vld [vmem:[%s744_s5 + $0x8] sm:$0xff]   ;;  %v466_v16 = vld [vmem:[#allocation8 + $0x8] sm:$0xff]   ;;  %s595_s23 = smov [#allocation10]  }
  0x4c   :  { %418 = vmatpush3.bf16.msra.mxu0 %v460_v1  ;;  %v463_v12 = vld [vmem:[%s744_s5] sm:$0xff]   ;;  %v465_v15 = vld [vmem:[#allocation8] sm:$0xff]   ;;  %s376_s25 = sshll.u32 %s595_s23, 4  ;;  %s377_s25 = int_to_ptr.vmem [resolvable:$true] %s376_s25 }
  0x4d   :  { %423 = vmatprep.subr.bf16.mxu0 %v593_v0  ;;  %440 = vmatpush3.bf16.msra.mxu1 %v465_v15  ;;  %v390_v17 = vld [vmem:[%s743_s4] ss:$0 sm:$0xff]  ;;  %v468_v26 = vld [vmem:[#allocation8 + $0x18] sm:$0xff]   ;;  %p562_p5 = scmp.lt.s32.totalorder %s377_s25, %s377_s25 }
  0x4e   :  { %441 = vmatprep.subr.bf16.mxu1 %v593_v0  ;;  %v467_v25 = vld [vmem:[#allocation8 + $0x10] sm:$0xff]  }
  0x4f   :  { %420 = vmatmul.mubr.msk.bf16.vlgmr.msra.gmra.mrb[0].mxu0 %vm103_vm1, %v87_v2  ;;  %v394_v27 = vld [vmem:[%s745_s6] ss:$0 sm:$0xff]  ;;  %s557_s6 = scalar_lea.vmem %s377_s25, 128 }
  0x50   :  { %424 = vmatpush3.bf16.msra.mxu0 %v461_v3  ;;  %427 = vmatprep.mubr.msk.bf16.mxu0 %vm594_vm0, %v593_v0  ;;  %v398_v35 = vld [vmem:[%s747_s8] ss:$0 sm:$0xff]  ;;  %p558_p4 = scmp.ne.s32.totalorder %s377_s25, %s557_s6  ;;  %p563_p6 = scmp.lt.s32.totalorder %s557_s6, %s557_s6 }
  0x51   :  { %425 = vmatprep.subr.bf16.mxu0 %v593_v0  ;;  %442 = vmatpush3.bf16.msra.mxu1 %v466_v16 }
  0x52   :  { %443 = vmatprep.subr.bf16.mxu1 %v593_v0  ;;  %p564_p7 = por %p563_p6, %p562_p5 }
  0x54   :  { %426 = vmatpush3.bf16.msra.mxu0 %v462_v4  ;;  %p565_p8 = pnand %p564_p7, %p558_p4 }
  0x55   :  { %431 = vmatprep.subr.bf16.mxu0 %v593_v0  ;;  %444 = vmatpush3.bf16.msra.mxu1 %v467_v25 }
  0x56   :  { %445 = vmatprep.subr.bf16.mxu1 %v593_v0 }
  0x59   :  { %446 = vmatpush3.bf16.msra.mxu1 %v468_v26 }
 0x122   :  { %v141_v6 = vpop.f32.mrb[0].mxu0 }
 0x123   :  { %v142_v7 = vadd.f32 %v387_v5, %v141_v6  ;;  %v421_v8 = vpop.f32.mrb[1].mxu0 }
 0x124   :  { %v144_v9 = vpop.f32.mrb[2].mxu0 }
 0x125   :  { %v147_v10 = vmax.f32 %v142_v7, 0.0  ;;  %v422_v11 = vpop.f32.mrb[3].mxu0 }
 0x127   :  { %v148_v13 = vpack.c.bf16 %v147_v10, %v147_v10 }
 0x129   :  { %428 = vmatmul.mubr.msk.bf16.vlgmr.msra.gmra.mrb[4].mxu0 %vm172_vm2, %v148_v13 }
 0x12a   :  { %432 = vmatpush3.bf16.msra.mxu0 %v463_v12  ;;  %435 = vmatprep.mubr.msk.bf16.mxu0 %vm594_vm0, %v593_v0 }
 0x12b   :  { %433 = vmatprep.subr.bf16.mxu0 %v593_v0 }
 0x12e   :  { %434 = vmatpush3.bf16.msra.mxu0 %v464_v14 }
 0x1fc   :  { %v210_v18 = vpop.f32.mrb[4].mxu0 }
 0x1fd   :  { %v211_v19 = vadd.f32 %v390_v17, %v210_v18  ;;  %v429_v20 = vpop.f32.mrb[5].mxu0 }
 0x1fe   :  { %v213_v21 = vpop.f32.mrb[6].mxu0 }
 0x1ff   :  { %v216_v22 = vmax.f32 %v211_v19, 0.0  ;;  %v430_v23 = vpop.f32.mrb[7].mxu0 }
 0x201   :  { %v217_v24 = vpack.c.bf16 %v216_v22, %v216_v22 }
 0x203   :  { %436 = vmatmul.mubr.msk.bf16.vlgmr.msra.gmra.mrb[8].mxu0 %vm172_vm2, %v217_v24 }
 0x2d6   :  { %v278_v28 = vpop.f32.mrb[8].mxu0 }
 0x2d7   :  { %v279_v29 = vadd.f32 %v394_v27, %v278_v28  ;;  %v437_v30 = vpop.f32.mrb[9].mxu0 }
 0x2d8   :  { %v281_v31 = vpop.f32.mrb[10].mxu0 }
 0x2d9   :  { %v284_v32 = vmax.f32 %v279_v29, 0.0  ;;  %v438_v33 = vpop.f32.mrb[11].mxu0 }
 0x2db   :  { %v285_v34 = vpack.c.bf16 %v284_v32, %v284_v32 }
 0x2dd   :  { %448 = vmatmul.mubr.msk.bf16.vlgmr.msra.gmra.mrb[0].mxu1 %vm325_vm3, %v285_v34 }
 0x3b0   :  { %v363_v36 = vpop.f32.mrb[0].mxu1 }
 0x3b1   :  { %v364_v37 = vadd.f32 %v398_v35, %v363_v36  ;;  %v449_v38 = vpop.f32.mrb[1].mxu1 }
 0x3b2   :  { %v366_v39 = vpop.f32.mrb[2].mxu1 }
 0x3b3   :  { %369 = vst [vmem:[#allocation10] sm:$0xff] %v364_v37  ;;  %v450_v40 = vpop.f32.mrb[3].mxu1 }
 0x3b4   :  { %568 = shalt.err (!%p565_p8)
}
 0x3b5   :  { %s569_s8 = scalar_lea.hbm %s748_s9, 128 }
 0x3b6   :  { %p570_p9 = scmp.ne.s32.totalorder %s748_s9, %s569_s8  ;;  %p573_p10 = scmp.lt.u32.totalorder %s569_s8, %s748_s9 }
 0x3b8   :  { %p575_p11 = pnand %p573_p10, %p570_p9 }
 0x3ba   :  { %578 = shalt.err (!%p575_p11)
}
 0x3bb   :  { %379 = dma.vmem_to_hbm [thread:$0]  %s377_s25, 128, %s748_s9, [#allocation4]  }
 0x3bc   :  { %585 = dma.done.wait [#allocation4], 128  }
 0x3bd   :  { %586 = vsyncadd [#allocation4], 4294967168 }
 0x3be   :  { %383 = vsyncpa [#allocation3], 1 }
 0x3bf   :  { %384 = vsyncpa [#allocation6], 1 }
 0x3c0   :  { %385 = vsyncpa [#allocation9], 1 }
 0x3c1   :  { %386 = vsyncpa [#allocation4], 1 }

// kernel: tpu_custom_call.1
= control target key start
LH: loop header
LB: loop body
LE: loop exit
PB: predicated region body
PF: predicated region fallthrough
CT: control target
= control target key end

     0   :  { %14 = vsyncpa [#allocation3], 0  ;;  %s739_s0 = inlined_call_operand.hbm [shape: bf16[8,16], index: 0, kind: input, shape index: {}]   ;;  %s740_s1 = inlined_call_operand.hbm [shape: bf16[16,32], index: 1, kind: input, shape index: {}]   ;;  %s741_s2 = inlined_call_operand.vmem [shape: f32[1,32], index: 2, kind: input, shape index: {}]   ;;  %s742_s3 = inlined_call_operand.hbm [shape: bf16[32,32], index: 3, kind: input, shape index: {}]   ;;  %s743_s4 = inlined_call_operand.vmem [shape: f32[1,32], index: 4, kind: input, shape index: {}]   ;;  %s744_s5 = inlined_call_operand.vmem [shape: bf16[32,64], index: 5, kind: input, shape index: {}]   ;;  %s745_s6 = inlined_call_operand.vmem [shape: f32[1,64], index: 6, kind: input, shape index: {}]   ;;  %s746_s7 = inlined_call_operand.hbm [shape: bf16[64,128], index: 7, kind: input, shape index: {}]   ;;  %s747_s8 = inlined_call_operand.vmem [shape: f32[1,128], index: 8, kind: input, shape index: {}]   ;;  %s748_s9 = inlined_call_operand.hbm [shape: f32[8,128], index: 9, kind: output, shape index: {}]  }
   0x1   :  { %15 = vsyncpa [#allocation6], 0 }
   0x2   :  { %16 = vsyncpa [#allocation9], 0 }
   0x3   :  { %17 = vsyncpa [#allocation4], 0  ;;  %s587_s30 = smov [#allocation5]   ;;  %s469_s13 = scalar_lea.hbm %s740_s1, 128 }
   0x4   :  { %s33_s10 = sshll.u32 %s587_s30, 4  ;;  %p470_p0 = scmp.ne.s32.totalorder %s740_s1, %s469_s13  ;;  %s34_s10 = int_to_ptr.vmem [resolvable:$true] %s33_s10 }
   0x5   :  { %p473_p1 = scmp.lt.u32.totalorder %s469_s13, %s740_s1 }
   0x7   :  { %p475_p2 = pnand %p473_p1, %p470_p0 }
   0x9   :  { %478 = shalt.err (!%p475_p2)
}
   0xa   :  { %s479_s18 = scalar_lea.vmem %s34_s10, 128  ;;  %p484_p4 = scmp.lt.s32.totalorder %s34_s10, %s34_s10 }
   0xb   :  { %p480_p3 = scmp.ne.s32.totalorder %s34_s10, %s479_s18  ;;  %p485_p5 = scmp.lt.s32.totalorder %s479_s18, %s479_s18 }
   0xd   :  { %p486_p6 = por %p485_p5, %p484_p4 }
   0xf   :  { %p487_p7 = pnand %p486_p6, %p480_p3 }
  0x11   :  { %490 = shalt.err (!%p487_p7)
}
  0x12   :  { %s588_s19 = smov 64   ;;  %s589_s20 = smov 4  }
  0x13   :  { %39 = dma.hbm_to_vmem [thread:$0]  %s740_s1, 128, %s34_s10, [#allocation6], %s588_s19, %s588_s19, %s589_s20  }
  0x14   :  { %s590_s23 = smov [#allocation2]   ;;  %s591_s25 = smov [#allocation7]  }
  0x15   :  { %s24_s24 = sshll.u32 %s590_s23, 4  ;;  %s47_s26 = sshll.u32 %s591_s25, 4  ;;  %s25_s24 = int_to_ptr.vmem [resolvable:$true] %s24_s24  ;;  %s48_s26 = int_to_ptr.vmem [resolvable:$true] %s47_s26 }
  0x16   :  { %s491_s29 = scalar_lea.hbm %s739_s0, 64 }
  0x17   :  { %p492_p8 = scmp.ne.s32.totalorder %s739_s0, %s491_s29  ;;  %p495_p9 = scmp.lt.u32.totalorder %s491_s29, %s739_s0 }
  0x19   :  { %p497_p10 = pnand %p495_p9, %p492_p8 }
  0x1b   :  { %500 = shalt.err (!%p497_p10)
}
  0x1c   :  { %s501_s1 = scalar_lea.vmem %s25_s24, 64  ;;  %p506_p12 = scmp.lt.s32.totalorder %s25_s24, %s25_s24 }
  0x1d   :  { %p502_p11 = scmp.ne.s32.totalorder %s25_s24, %s501_s1  ;;  %p507_p13 = scmp.lt.s32.totalorder %s501_s1, %s501_s1 }
  0x1f   :  { %p508_p0 = por %p507_p13, %p506_p12 }
  0x21   :  { %p509_p1 = pnand %p508_p0, %p502_p11 }
  0x23   :  { %512 = shalt.err (!%p509_p1)
}
  0x24   :  { %27 = dma.hbm_to_vmem [thread:$0]  %s739_s0, 64, %s25_s24, [#allocation3]  }
  0x25   :  { %s513_s17 = scalar_lea.hbm %s742_s3, 256 }
  0x26   :  { %p514_p2 = scmp.ne.s32.totalorder %s742_s3, %s513_s17  ;;  %p517_p3 = scmp.lt.u32.totalorder %s513_s17, %s742_s3 }
  0x28   :  { %p519_p4 = pnand %p517_p3, %p514_p2 }
  0x2a   :  { %522 = shalt.err (!%p519_p4)
}
  0x2b   :  { %s523_s25 = scalar_lea.vmem %s48_s26, 256  ;;  %p528_p6 = scmp.lt.s32.totalorder %s48_s26, %s48_s26 }
  0x2c   :  { %p524_p5 = scmp.ne.s32.totalorder %s48_s26, %s523_s25  ;;  %p529_p7 = scmp.lt.s32.totalorder %s523_s25, %s523_s25 }
  0x2e   :  { %p530_p8 = por %p529_p7, %p528_p6 }
  0x30   :  { %p531_p9 = pnand %p530_p8, %p524_p5 }
  0x32   :  { %534 = shalt.err (!%p531_p9)
}
  0x33   :  { %53 = dma.hbm_to_vmem [thread:$0]  %s742_s3, 256, %s48_s26, [#allocation6], %s588_s19, %s588_s19, %s589_s20  }
  0x34   :  { %s592_s27 = smov [#allocation8]   ;;  %s535_s11 = scalar_lea.hbm %s746_s7, 512 }
  0x35   :  { %s65_s28 = sshll.u32 %s592_s27, 4  ;;  %p536_p10 = scmp.ne.s32.totalorder %s746_s7, %s535_s11  ;;  %s66_s28 = int_to_ptr.vmem [resolvable:$true] %s65_s28 }
  0x36   :  { %p539_p11 = scmp.lt.u32.totalorder %s535_s11, %s746_s7 }
  0x38   :  { %p541_p12 = pnand %p539_p11, %p536_p10 }
  0x3a   :  { %544 = shalt.err (!%p541_p12)
}
  0x3b   :  { %s545_s14 = scalar_lea.vmem %s66_s28, 512  ;;  %p550_p0 = scmp.lt.s32.totalorder %s66_s28, %s66_s28 }
  0x3c   :  { %p546_p13 = scmp.ne.s32.totalorder %s66_s28, %s545_s14  ;;  %p551_p1 = scmp.lt.s32.totalorder %s545_s14, %s545_s14 }
  0x3e   :  { %p552_p2 = por %p551_p1, %p550_p0 }
  0x40   :  { %p553_p3 = pnand %p552_p2, %p546_p13 }
  0x42   :  { %556 = shalt.err (!%p553_p3)
}
  0x43   :  { %71 = dma.hbm_to_vmem [thread:$0]  %s746_s7, 512, %s66_s28, [#allocation9], %s588_s19, %s588_s19, %s589_s20  }
  0x44   :  { %579 = dma.done.wait [#allocation3], 64  }
  0x45   :  { %580 = vsyncadd [#allocation3], 4294967232 }
  0x46   :  { %581 = dma.done.wait [#allocation6], 384  }
  0x47   :  { %582 = vsyncadd [#allocation6], 4294966912 }
  0x48   :  { %583 = dma.done.wait [#allocation9], 512  }
  0x49   :  { %584 = vsyncadd [#allocation9], 4294966784  ;;  %v593_v0 = vmov 0.0   ;;  %vm594_vm0 = vmmov 0   ;;  %v460_v1 = vld [vmem:[#allocation5] sm:$0xff]   ;;  %vm103_vm1 = vcmask 130048  }
  0x4a   :  { %417 = vmatprep.subr.bf16.mxu0 %v593_v0  ;;  %419 = vmatprep.mubr.msk.bf16.mxu0 %vm594_vm0, %v593_v0  ;;  %v87_v2 = vld [vmem:[#allocation2] sm:$0xf]  ;;  %v461_v3 = vld [vmem:[#allocation7] sm:$0xff]   ;;  %v462_v4 = vld [vmem:[#allocation7 + $0x8] sm:$0xff]   ;;  %vm172_vm2 = vcmask 261120   ;;  %vm325_vm3 = vcmask 523264  }
  0x4b   :  { %439 = vmatprep.subr.bf16.mxu1 %v593_v0  ;;  %447 = vmatprep.mubr.msk.bf16.mxu1 %vm594_vm0, %v593_v0  ;;  %v387_v5 = vld [vmem:[%s741_s2] ss:$0 sm:$0xff]  ;;  %v464_v14 = vld [vmem:[%s744_s5 + $0x8] sm:$0xff]   ;;  %v466_v16 = vld [vmem:[#allocation8 + $0x8] sm:$0xff]   ;;  %s595_s23 = smov [#allocation10]  }
  0x4c   :  { %418 = vmatpush3.bf16.msra.mxu0 %v460_v1  ;;  %v463_v12 = vld [vmem:[%s744_s5] sm:$0xff]   ;;  %v465_v15 = vld [vmem:[#allocation8] sm:$0xff]   ;;  %s376_s25 = sshll.u32 %s595_s23, 4  ;;  %s377_s25 = int_to_ptr.vmem [resolvable:$true] %s376_s25 }
  0x4d   :  { %423 = vmatprep.subr.bf16.mxu0 %v593_v0  ;;  %440 = vmatpush3.bf16.msra.mxu1 %v465_v15  ;;  %v390_v17 = vld [vmem:[%s743_s4] ss:$0 sm:$0xff]  ;;  %v468_v26 = vld [vmem:[#allocation8 + $0x18] sm:$0xff]   ;;  %p562_p5 = scmp.lt.s32.totalorder %s377_s25, %s377_s25 }
  0x4e   :  { %441 = vmatprep.subr.bf16.mxu1 %v593_v0  ;;  %v467_v25 = vld [vmem:[#allocation8 + $0x10] sm:$0xff]  }
  0x4f   :  { %420 = vmatmul.mubr.msk.bf16.vlgmr.msra.gmra.mrb[0].mxu0 %vm103_vm1, %v87_v2  ;;  %v394_v27 = vld [vmem:[%s745_s6] ss:$0 sm:$0xff]  ;;  %s557_s6 = scalar_lea.vmem %s377_s25, 128 }
  0x50   :  { %424 = vmatpush3.bf16.msra.mxu0 %v461_v3  ;;  %427 = vmatprep.mubr.msk.bf16.mxu0 %vm594_vm0, %v593_v0  ;;  %v398_v35 = vld [vmem:[%s747_s8] ss:$0 sm:$0xff]  ;;  %p558_p4 = scmp.ne.s32.totalorder %s377_s25, %s557_s6  ;;  %p563_p6 = scmp.lt.s32.totalorder %s557_s6, %s557_s6 }
  0x51   :  { %425 = vmatprep.subr.bf16.mxu0 %v593_v0  ;;  %442 = vmatpush3.bf16.msra.mxu1 %v466_v16 }
  0x52   :  { %443 = vmatprep.subr.bf16.mxu1 %v593_v0  ;;  %p564_p7 = por %p563_p6, %p562_p5 }
  0x54   :  { %426 = vmatpush3.bf16.msra.mxu0 %v462_v4  ;;  %p565_p8 = pnand %p564_p7, %p558_p4 }
  0x55   :  { %431 = vmatprep.subr.bf16.mxu0 %v593_v0  ;;  %444 = vmatpush3.bf16.msra.mxu1 %v467_v25 }
  0x56   :  { %445 = vmatprep.subr.bf16.mxu1 %v593_v0 }
  0x59   :  { %446 = vmatpush3.bf16.msra.mxu1 %v468_v26 }
 0x122   :  { %v141_v6 = vpop.f32.mrb[0].mxu0 }
 0x123   :  { %v142_v7 = vadd.f32 %v387_v5, %v141_v6  ;;  %v421_v8 = vpop.f32.mrb[1].mxu0 }
 0x124   :  { %v144_v9 = vpop.f32.mrb[2].mxu0 }
 0x125   :  { %v147_v10 = vmax.f32 %v142_v7, 0.0  ;;  %v422_v11 = vpop.f32.mrb[3].mxu0 }
 0x127   :  { %v148_v13 = vpack.c.bf16 %v147_v10, %v147_v10 }
 0x129   :  { %428 = vmatmul.mubr.msk.bf16.vlgmr.msra.gmra.mrb[4].mxu0 %vm172_vm2, %v148_v13 }
 0x12a   :  { %432 = vmatpush3.bf16.msra.mxu0 %v463_v12  ;;  %435 = vmatprep.mubr.msk.bf16.mxu0 %vm594_vm0, %v593_v0 }
 0x12b   :  { %433 = vmatprep.subr.bf16.mxu0 %v593_v0 }
 0x12e   :  { %434 = vmatpush3.bf16.msra.mxu0 %v464_v14 }
 0x1fc   :  { %v210_v18 = vpop.f32.mrb[4].mxu0 }
 0x1fd   :  { %v211_v19 = vadd.f32 %v390_v17, %v210_v18  ;;  %v429_v20 = vpop.f32.mrb[5].mxu0 }
 0x1fe   :  { %v213_v21 = vpop.f32.mrb[6].mxu0 }
 0x1ff   :  { %v216_v22 = vmax.f32 %v211_v19, 0.0  ;;  %v430_v23 = vpop.f32.mrb[7].mxu0 }
 0x201   :  { %v217_v24 = vpack.c.bf16 %v216_v22, %v216_v22 }
 0x203   :  { %436 = vmatmul.mubr.msk.bf16.vlgmr.msra.gmra.mrb[8].mxu0 %vm172_vm2, %v217_v24 }
 0x2d6   :  { %v278_v28 = vpop.f32.mrb[8].mxu0 }
 0x2d7   :  { %v279_v29 = vadd.f32 %v394_v27, %v278_v28  ;;  %v437_v30 = vpop.f32.mrb[9].mxu0 }
 0x2d8   :  { %v281_v31 = vpop.f32.mrb[10].mxu0 }
 0x2d9   :  { %v284_v32 = vmax.f32 %v279_v29, 0.0  ;;  %v438_v33 = vpop.f32.mrb[11].mxu0 }
 0x2db   :  { %v285_v34 = vpack.c.bf16 %v284_v32, %v284_v32 }
 0x2dd   :  { %448 = vmatmul.mubr.msk.bf16.vlgmr.msra.gmra.mrb[0].mxu1 %vm325_vm3, %v285_v34 }
 0x3b0   :  { %v363_v36 = vpop.f32.mrb[0].mxu1 }
 0x3b1   :  { %v364_v37 = vadd.f32 %v398_v35, %v363_v36  ;;  %v449_v38 = vpop.f32.mrb[1].mxu1 }
 0x3b2   :  { %v366_v39 = vpop.f32.mrb[2].mxu1 }
 0x3b3   :  { %369 = vst [vmem:[#allocation10] sm:$0xff] %v364_v37  ;;  %v450_v40 = vpop.f32.mrb[3].mxu1 }
 0x3b4   :  { %568 = shalt.err (!%p565_p8)
}
 0x3b5   :  { %s569_s8 = scalar_lea.hbm %s748_s9, 128 }
 0x3b6   :  { %p570_p9 = scmp.ne.s32.totalorder %s748_s9, %s569_s8  ;;  %p573_p10 = scmp.lt.u32.totalorder %s569_s8, %s748_s9 }
 0x3b8   :  { %p575_p11 = pnand %p573_p10, %p570_p9 }
 0x3ba   :  { %578 = shalt.err (!%p575_p11)
}
 0x3bb   :  { %379 = dma.vmem_to_hbm [thread:$0]  %s377_s25, 128, %s748_s9, [#allocation4]  }
 0x3bc   :  { %585 = dma.done.wait [#allocation4], 128  }
 0x3bd   :  { %586 = vsyncadd [#allocation4], 4294967168 }
 0x3be   :  { %383 = vsyncpa [#allocation3], 1 }
 0x3bf   :  { %384 = vsyncpa [#allocation6], 1 }
 0x3c0   :  { %385 = vsyncpa [#allocation9], 1 }
 0x3c1   :  { %386 = vsyncpa [#allocation4], 1 }

</bundles_post_ra>
